<compile_context>
chip_gen: v7x
topology: tpu7x:2x2x1
jax: 0.10.0
libtpu: 0.0.40
codegen_flags: <defaults>
</compile_context>

<pallas_src>
import functools
import math

import jax
import jax.numpy as jnp
from jax.experimental import pallas as pl
from jax.experimental.pallas import tpu as pltpu


def _round_up(x, m):
    return ((x + m - 1) // m) * m


def _dueling_kernel(x_ref, w1_ref, b1_ref, wh_ref, bh_ref, wq_ref, bq_ref, s_ref,
                    out_ref, *, num_actions, num_atoms):
    # ---- fused MLP: 3 matmuls, activations never leave VMEM -----------------
    x = x_ref[...]
    f = jnp.dot(x.astype(w1_ref.dtype), w1_ref[...],
                preferred_element_type=jnp.float32) + b1_ref[...]
    f = jnp.maximum(f, 0.0)

    # fused value|advantage hidden layer: (TB, 256)
    h = jnp.dot(f.astype(wh_ref.dtype), wh_ref[...],
                preferred_element_type=jnp.float32) + bh_ref[...]
    h = jnp.maximum(h, 0.0)

    # fused head + dueling combine folded into the weights: q logits (TB, A*N)
    q = jnp.dot(h.astype(wq_ref.dtype), wq_ref[...],
                preferred_element_type=jnp.float32) + bq_ref[...]

    # ---- per-action softmax over atoms --------------------------------------
    n = num_atoms
    tb = q.shape[0]
    # Per-segment max (kept per-action for stability; A small lane reductions).
    seg_max = [jnp.max(q[:, i * n:(i + 1) * n], axis=1, keepdims=True)
               for i in range(num_actions)]
    m_b = jnp.concatenate([jnp.broadcast_to(m, (tb, n)) for m in seg_max], axis=1)
    # Single EUP exp launch on the whole slab.
    e = jnp.exp(q - m_b)
    # Per-action denominators, broadcast back, via one block-diagonal matmul.
    s_b = jnp.dot(e, s_ref[...], preferred_element_type=jnp.float32)
    out_ref[...] = (e * pl.reciprocal(s_b, approx=True)).astype(out_ref.dtype)


def _const_spec(a):
    return pl.BlockSpec(a.shape, lambda *_: (0,) * a.ndim)


def dueling_forward(x, packed, *, num_actions, num_atoms, block_b=256):
    """Fused Pallas forward. x: (B, input_dim) f32. Returns (B, A, num_atoms) f32."""
    B, D = x.shape
    W = num_actions * num_atoms

    TB = min(block_b, _round_up(max(B, 8), 8))       # batch tile, multiple of 8
    Bp = _round_up(B, TB)
    if Bp != B:
        x = jnp.pad(x, ((0, Bp - B), (0, 0)))        # padded rows sliced off below

    weights = (packed["w1"], packed["b1"], packed["wh"], packed["bh"],
               packed["wq"], packed["bq"], packed["S"])

    flat = pl.pallas_call(
        functools.partial(_dueling_kernel,
                          num_actions=num_actions, num_atoms=num_atoms),
        grid=(Bp // TB,),
        in_specs=[pl.BlockSpec((TB, D), lambda i: (i, 0))]
                 + [_const_spec(a) for a in weights],
        out_specs=pl.BlockSpec((TB, W), lambda i: (i, 0)),
        out_shape=jax.ShapeDtypeStruct((Bp, W), jnp.float32),
        compiler_params=pltpu.CompilerParams(dimension_semantics=("parallel",)),
    )(x, *weights)

    return flat[:B].reshape(B, num_actions, num_atoms)


def _linear_init(key, fan_in, fan_out):
    # PyTorch nn.Linear-style init; weight stored pre-transposed as (in, out).
    kw, kb = jax.random.split(key)
    bound = 1.0 / math.sqrt(fan_in)
    w = jax.random.uniform(kw, (fan_in, fan_out), jnp.float32, -bound, bound)
    b = jax.random.uniform(kb, (1, fan_out), jnp.float32, -bound, bound)
    return w, b


def init_dueling(key, input_dim, num_actions, num_atoms, hidden=128):
    k1, k2, k3, k4, k5 = jax.random.split(key, 5)
    w1, b1 = _linear_init(k1, input_dim, hidden)
    wv1, bv1 = _linear_init(k2, hidden, hidden)
    wv2, bv2 = _linear_init(k3, hidden, num_atoms)
    wa1, ba1 = _linear_init(k4, hidden, hidden)
    wa2, ba2 = _linear_init(k5, hidden, num_actions * num_atoms)
    return {"w1": w1, "b1": b1,
            "wv1": wv1, "bv1": bv1, "wv2": wv2, "bv2": bv2,
            "wa1": wa1, "ba1": ba1, "wa2": wa2, "ba2": ba2}


def pack_dueling_params(params, *, num_actions, num_atoms,
                        weight_dtype=jnp.float32):
    """Pack raw per-layer weights into the fused kernel layout (done once).

    - wh = [wv1 | wa1]              (hidden, 2*hidden)   -> one hidden matmul
    - wq folds value replication AND advantage mean-subtraction (both linear):
        q[:, a*N + j] = v[:, j] + adv[:, a*N + j] - mean_a' adv[:, a'*N + j]
    - S is the block-diagonal one-hot matrix used for per-action atom sums.
    Weights can be bf16 (v6e/v7x MXU); biases / S stay f32 (f32 elementwise math).
    """
    A, N = num_actions, num_atoms
    k = jnp.arange(A * N)
    # Mean-over-actions (per atom) matrix and its subtraction.
    M = (k[:, None] % N == k[None, :] % N).astype(jnp.float32) / A
    P = jnp.eye(A * N, dtype=jnp.float32) - M

    wh = jnp.concatenate([params["wv1"], params["wa1"]], axis=1)
    bh = jnp.concatenate([params["bv1"], params["ba1"]], axis=1)

    wq_v = jnp.tile(params["wv2"], (1, A))            # value replicated per action
    wq_a = params["wa2"] @ P                          # advantage with mean folded
    wq = jnp.concatenate([wq_v, wq_a], axis=0)        # (2*hidden, A*N)
    bq = jnp.tile(params["bv2"], (1, A)) + params["ba2"] @ P

    S = (k[:, None] // N == k[None, :] // N).astype(jnp.float32)

    return {"w1": params["w1"].astype(weight_dtype),
            "b1": params["b1"].astype(jnp.float32),
            "wh": wh.astype(weight_dtype),
            "bh": bh.astype(jnp.float32),
            "wq": wq.astype(weight_dtype),
            "bq": bq.astype(jnp.float32),
            "S": S}


def dueling_reference(x, params, *, num_actions, num_atoms):
    f = jnp.maximum(x @ params["w1"] + params["b1"], 0.0)
    vh = jnp.maximum(f @ params["wv1"] + params["bv1"], 0.0)
    v = vh @ params["wv2"] + params["bv2"]
    ah = jnp.maximum(f @ params["wa1"] + params["ba1"], 0.0)
    a = ah @ params["wa2"] + params["ba2"]
    B = x.shape[0]
    v3 = v.reshape(B, 1, num_atoms)
    a3 = a.reshape(B, num_actions, num_atoms)
    q = v3 + a3 - a3.mean(axis=1, keepdims=True)
    return jax.nn.softmax(q, axis=2)


if __name__ == "__main__":
    key = jax.random.PRNGKey(0)
    k_param, k_x = jax.random.split(key)

    batch, input_dim, num_actions, num_atoms = 40, 32, 4, 8

    params = init_dueling(k_param, input_dim, num_actions, num_atoms)
    x = jax.random.normal(k_x, (batch, input_dim), dtype=jnp.float32)
    ref = dueling_reference(x, params, num_actions=num_actions, num_atoms=num_atoms)

    # f32 weights; block_b=16 so the 40-row batch exercises the grid (3 steps,
    # padded to 48 and sliced back).
    packed = pack_dueling_params(params, num_actions=num_actions, num_atoms=num_atoms)
    out = dueling_forward(x, packed, num_actions=num_actions, num_atoms=num_atoms,
                          block_b=16)
    jax.block_until_ready(out)

    assert out.shape == (batch, num_actions, num_atoms), "bad output shape"
    assert bool(jnp.all(jnp.isfinite(out))), "non-finite output"
    # Tolerance covers the approx-reciprocal normalization (per review) plus the
    # mathematically-equivalent weight refactoring; structural bugs are >> 2e-2.
    assert jnp.allclose(out, ref, atol=2e-2), "mismatch vs pure-JAX reference"
    assert jnp.allclose(out.sum(axis=2), jnp.ones((batch, num_actions)), atol=2e-2)

    # bf16 weight path (v6e/v7x MXU-native), f32 accumulation + f32 softmax.
    packed_bf16 = pack_dueling_params(params, num_actions=num_actions,
                                      num_atoms=num_atoms,
                                      weight_dtype=jnp.bfloat16)
    out_bf16 = dueling_forward(x, packed_bf16, num_actions=num_actions,
                               num_atoms=num_atoms, block_b=16)
    jax.block_until_ready(out_bf16)
    assert bool(jnp.all(jnp.isfinite(out_bf16))), "non-finite bf16 output"
    assert jnp.allclose(out_bf16, ref, atol=5e-2), "bf16 path mismatch"

    print("KERNEL_OK")
</pallas_src>

<mosaic_0001>
module attributes {stable_mosaic.version = 11 : i64} {
  func.func @_dueling_kernel(%arg0: i32, %arg1: memref<16x32xf32, #tpu.memory_space<vmem>>, %arg2: memref<32x128xf32, #tpu.memory_space<vmem>>, %arg3: memref<1x128xf32, #tpu.memory_space<vmem>>, %arg4: memref<128x256xf32, #tpu.memory_space<vmem>>, %arg5: memref<1x256xf32, #tpu.memory_space<vmem>>, %arg6: memref<256x32xf32, #tpu.memory_space<vmem>>, %arg7: memref<1x32xf32, #tpu.memory_space<vmem>>, %arg8: memref<32x32xf32, #tpu.memory_space<vmem>>, %arg9: memref<16x32xf32, #tpu.memory_space<vmem>>) attributes {dimension_semantics = [#tpu.dimension_semantics<parallel>], iteration_bounds = array<i64: 3>, scalar_prefetch = 0 : i64, scratch_operands = 0 : i64, tpu.core_type = #tpu.core_type<tc>, window_params = [{transform_indices = @transform_0, window_bounds = array<i64: 16, 32>}, {pipeline_mode = #tpu.pipeline_mode<synchronous>, transform_indices = @transform_1, window_bounds = array<i64: 32, 128>}, {pipeline_mode = #tpu.pipeline_mode<synchronous>, transform_indices = @transform_2, window_bounds = array<i64: 1, 128>}, {pipeline_mode = #tpu.pipeline_mode<synchronous>, transform_indices = @transform_3, window_bounds = array<i64: 128, 256>}, {pipeline_mode = #tpu.pipeline_mode<synchronous>, transform_indices = @transform_4, window_bounds = array<i64: 1, 256>}, {pipeline_mode = #tpu.pipeline_mode<synchronous>, transform_indices = @transform_5, window_bounds = array<i64: 256, 32>}, {pipeline_mode = #tpu.pipeline_mode<synchronous>, transform_indices = @transform_6, window_bounds = array<i64: 1, 32>}, {pipeline_mode = #tpu.pipeline_mode<synchronous>, transform_indices = @transform_7, window_bounds = array<i64: 32, 32>}, {transform_indices = @transform_8, window_bounds = array<i64: 16, 32>}]} {
    %c0 = arith.constant 0 : index
    %c0_0 = arith.constant 0 : index
    %0 = vector.load %arg1[%c0, %c0_0] : memref<16x32xf32, #tpu.memory_space<vmem>>, vector<16x32xf32>
    %c0_1 = arith.constant 0 : index
    %c0_2 = arith.constant 0 : index
    %1 = vector.load %arg2[%c0_1, %c0_2] : memref<32x128xf32, #tpu.memory_space<vmem>>, vector<32x128xf32>
    %cst = arith.constant dense<0.000000e+00> : vector<16x128xf32>
    %2 = tpu.matmul %0, %1, %cst {dimension_numbers = #tpu.dot_dimension_numbers<[1], [0], [0], [1], [0, 0, 1, 1], [], []>} : vector<16x32xf32>, vector<32x128xf32>, vector<16x128xf32> -> vector<16x128xf32>
    %c0_3 = arith.constant 0 : index
    %c0_4 = arith.constant 0 : index
    %3 = vector.load %arg3[%c0_3, %c0_4] : memref<1x128xf32, #tpu.memory_space<vmem>>, vector<1x128xf32>
    %4 = vector.broadcast %3 : vector<1x128xf32> to vector<16x128xf32>
    %5 = arith.addf %2, %4 : vector<16x128xf32>
    %cst_5 = arith.constant 0.000000e+00 : f32
    %6 = vector.broadcast %cst_5 : f32 to vector<16x128xf32>
    %7 = arith.maximumf %5, %6 : vector<16x128xf32>
    %c0_6 = arith.constant 0 : index
    %c0_7 = arith.constant 0 : index
    %8 = vector.load %arg4[%c0_6, %c0_7] : memref<128x256xf32, #tpu.memory_space<vmem>>, vector<128x256xf32>
    %cst_8 = arith.constant dense<0.000000e+00> : vector<16x256xf32>
    %9 = tpu.matmul %7, %8, %cst_8 {dimension_numbers = #tpu.dot_dimension_numbers<[1], [0], [0], [1], [0, 0, 1, 1], [], []>} : vector<16x128xf32>, vector<128x256xf32>, vector<16x256xf32> -> vector<16x256xf32>
    %c0_9 = arith.constant 0 : index
    %c0_10 = arith.constant 0 : index
    %10 = vector.load %arg5[%c0_9, %c0_10] : memref<1x256xf32, #tpu.memory_space<vmem>>, vector<1x256xf32>
    %11 = vector.broadcast %10 : vector<1x256xf32> to vector<16x256xf32>
    %12 = arith.addf %9, %11 : vector<16x256xf32>
    %cst_11 = arith.constant 0.000000e+00 : f32
    %13 = vector.broadcast %cst_11 : f32 to vector<16x256xf32>
    %14 = arith.maximumf %12, %13 : vector<16x256xf32>
    %c0_12 = arith.constant 0 : index
    %c0_13 = arith.constant 0 : index
    %15 = vector.load %arg6[%c0_12, %c0_13] : memref<256x32xf32, #tpu.memory_space<vmem>>, vector<256x32xf32>
    %cst_14 = arith.constant dense<0.000000e+00> : vector<16x32xf32>
    %16 = tpu.matmul %14, %15, %cst_14 {dimension_numbers = #tpu.dot_dimension_numbers<[1], [0], [0], [1], [0, 0, 1, 1], [], []>} : vector<16x256xf32>, vector<256x32xf32>, vector<16x32xf32> -> vector<16x32xf32>
    %c0_15 = arith.constant 0 : index
    %c0_16 = arith.constant 0 : index
    %17 = vector.load %arg7[%c0_15, %c0_16] : memref<1x32xf32, #tpu.memory_space<vmem>>, vector<1x32xf32>
    %18 = vector.broadcast %17 : vector<1x32xf32> to vector<16x32xf32>
    %19 = arith.addf %16, %18 : vector<16x32xf32>
    %20 = vector.extract_strided_slice %19 {offsets = [0, 0], sizes = [16, 8], strides = [1, 1]} : vector<16x32xf32> to vector<16x8xf32>
    %cst_17 = arith.constant dense<0xFF800000> : vector<16xf32>
    %21 = vector.multi_reduction <maximumf>, %20, %cst_17 [1] : vector<16x8xf32> to vector<16xf32>
    %22 = vector.shape_cast %21 : vector<16xf32> to vector<16x1xf32>
    %23 = vector.extract_strided_slice %19 {offsets = [0, 8], sizes = [16, 8], strides = [1, 1]} : vector<16x32xf32> to vector<16x8xf32>
    %cst_18 = arith.constant dense<0xFF800000> : vector<16xf32>
    %24 = vector.multi_reduction <maximumf>, %23, %cst_18 [1] : vector<16x8xf32> to vector<16xf32>
    %25 = vector.shape_cast %24 : vector<16xf32> to vector<16x1xf32>
    %26 = vector.extract_strided_slice %19 {offsets = [0, 16], sizes = [16, 8], strides = [1, 1]} : vector<16x32xf32> to vector<16x8xf32>
    %cst_19 = arith.constant dense<0xFF800000> : vector<16xf32>
    %27 = vector.multi_reduction <maximumf>, %26, %cst_19 [1] : vector<16x8xf32> to vector<16xf32>
    %28 = vector.shape_cast %27 : vector<16xf32> to vector<16x1xf32>
    %29 = vector.extract_strided_slice %19 {offsets = [0, 24], sizes = [16, 8], strides = [1, 1]} : vector<16x32xf32> to vector<16x8xf32>
    %cst_20 = arith.constant dense<0xFF800000> : vector<16xf32>
    %30 = vector.multi_reduction <maximumf>, %29, %cst_20 [1] : vector<16x8xf32> to vector<16xf32>
    %31 = vector.shape_cast %30 : vector<16xf32> to vector<16x1xf32>
    %32 = vector.shape_cast %22 : vector<16x1xf32> to vector<16x1xf32>
    %33 = vector.broadcast %32 : vector<16x1xf32> to vector<16x8xf32>
    %34 = vector.shape_cast %25 : vector<16x1xf32> to vector<16x1xf32>
    %35 = vector.broadcast %34 : vector<16x1xf32> to vector<16x8xf32>
    %36 = vector.shape_cast %28 : vector<16x1xf32> to vector<16x1xf32>
    %37 = vector.broadcast %36 : vector<16x1xf32> to vector<16x8xf32>
    %38 = vector.shape_cast %31 : vector<16x1xf32> to vector<16x1xf32>
    %39 = vector.broadcast %38 : vector<16x1xf32> to vector<16x8xf32>
    %40 = tpu.concatenate %33, %35, %37, %39 in 1 : vector<16x8xf32>, vector<16x8xf32>, vector<16x8xf32>, vector<16x8xf32> -> vector<16x32xf32>
    %41 = arith.subf %19, %40 : vector<16x32xf32>
    %42 = math.exp %41 : vector<16x32xf32>
    %c0_21 = arith.constant 0 : index
    %c0_22 = arith.constant 0 : index
    %43 = vector.load %arg8[%c0_21, %c0_22] : memref<32x32xf32, #tpu.memory_space<vmem>>, vector<32x32xf32>
    %cst_23 = arith.constant dense<0.000000e+00> : vector<16x32xf32>
    %44 = tpu.matmul %42, %43, %cst_23 {dimension_numbers = #tpu.dot_dimension_numbers<[1], [0], [0], [1], [0, 0, 1, 1], [], []>} : vector<16x32xf32>, vector<32x32xf32>, vector<16x32xf32> -> vector<16x32xf32>
    %45 = tpu.reciprocal %44 {approx = true} : vector<16x32xf32> -> vector<16x32xf32>
    %46 = arith.mulf %42, %45 : vector<16x32xf32>
    %c0_24 = arith.constant 0 : index
    %c0_25 = arith.constant 0 : index
    %47 = vector.load %arg9[%c0_24, %c0_25] : memref<16x32xf32, #tpu.memory_space<vmem>>, vector<16x32xf32>
    tpu.vector_store %arg9[%c0_24, %c0_25], %46 {strides = array<i32>} : memref<16x32xf32, #tpu.memory_space<vmem>>, vector<16x32xf32>,
    return
  }
  func.func @transform_0(%arg0: i32) -> (i32, i32) {
    %c0_i32 = arith.constant 0 : i32
    %c0_i32_0 = arith.constant 0 : i32
    return %arg0, %c0_i32 : i32, i32
  }
  func.func @transform_1(%arg0: i32) -> (i32, i32) {
    %c0_i32 = arith.constant 0 : i32
    %c0_i32_0 = arith.constant 0 : i32
    %c0_i32_1 = arith.constant 0 : i32
    return %c0_i32, %c0_i32_0 : i32, i32
  }
  func.func @transform_2(%arg0: i32) -> (i32, i32) {
    %c0_i32 = arith.constant 0 : i32
    %c0_i32_0 = arith.constant 0 : i32
    %c0_i32_1 = arith.constant 0 : i32
    return %c0_i32, %c0_i32_0 : i32, i32
  }
  func.func @transform_3(%arg0: i32) -> (i32, i32) {
    %c0_i32 = arith.constant 0 : i32
    %c0_i32_0 = arith.constant 0 : i32
    %c0_i32_1 = arith.constant 0 : i32
    return %c0_i32, %c0_i32_0 : i32, i32
  }
  func.func @transform_4(%arg0: i32) -> (i32, i32) {
    %c0_i32 = arith.constant 0 : i32
    %c0_i32_0 = arith.constant 0 : i32
    %c0_i32_1 = arith.constant 0 : i32
    return %c0_i32, %c0_i32_0 : i32, i32
  }
  func.func @transform_5(%arg0: i32) -> (i32, i32) {
    %c0_i32 = arith.constant 0 : i32
    %c0_i32_0 = arith.constant 0 : i32
    %c0_i32_1 = arith.constant 0 : i32
    return %c0_i32, %c0_i32_0 : i32, i32
  }
  func.func @transform_6(%arg0: i32) -> (i32, i32) {
    %c0_i32 = arith.constant 0 : i32
    %c0_i32_0 = arith.constant 0 : i32
    %c0_i32_1 = arith.constant 0 : i32
    return %c0_i32, %c0_i32_0 : i32, i32
  }
  func.func @transform_7(%arg0: i32) -> (i32, i32) {
    %c0_i32 = arith.constant 0 : i32
    %c0_i32_0 = arith.constant 0 : i32
    %c0_i32_1 = arith.constant 0 : i32
    return %c0_i32, %c0_i32_0 : i32, i32
  }
  func.func @transform_8(%arg0: i32) -> (i32, i32) {
    %c0_i32 = arith.constant 0 : i32
    %c0_i32_0 = arith.constant 0 : i32
    return %arg0, %c0_i32 : i32, i32
  }
}

</mosaic_0001>

<bundles_post_ra>
// kernel: tpu_custom_call.1
= control target key start
LH: loop header
LB: loop body
LE: loop exit
PB: predicated region body
PF: predicated region fallthrough
CT: control target
= control target key end

     0   :  { %s1074_s27 = smov 0   ;;  %s1333_s0 = inlined_call_operand.vmem [shape: f32[48,32], index: 0, kind: input, shape index: {}]   ;;  %s1334_s1 = inlined_call_operand.vmem [shape: f32[32,128], index: 1, kind: input, shape index: {}]   ;;  %s1335_s2 = inlined_call_operand.vmem [shape: f32[1,128], index: 2, kind: input, shape index: {}]   ;;  %s1336_s3 = inlined_call_operand.vmem [shape: f32[128,256], index: 3, kind: input, shape index: {}]   ;;  %s1337_s4 = inlined_call_operand.vmem [shape: f32[1,256], index: 4, kind: input, shape index: {}]   ;;  %s1338_s5 = inlined_call_operand.vmem [shape: f32[256,32], index: 5, kind: input, shape index: {}]   ;;  %s1339_s6 = inlined_call_operand.vmem [shape: f32[1,32], index: 6, kind: input, shape index: {}]   ;;  %s1340_s7 = inlined_call_operand.vmem [shape: f32[32,32], index: 7, kind: input, shape index: {}]   ;;  %s1341_s8 = inlined_call_operand.vmem [shape: f32[48,32], index: 8, kind: output, shape index: {}]  }
   0x1 LB: > { %s834_s28 = sadd.s32 4294967295, %s1026_s27   ;;  %p838_p0 = scmp.ge.s32.totalorder %s1026_s27, 1  ;;  %s1026_s27 = sphi %s1074_s27, %s18_s27  }
   0x2   : > { %p263_p1 = scmp.lt.s32.totalorder %s1026_s27, 4 }
   0x4   : > { %p264_p2 = pnand %p838_p0, %p263_p1 }
   0x5   : > { %v311_v0 = vld [vmem:[%s1334_s1] sm:$0xff] (!%p264_p2)  ;;  %v312_v1 = vld [vmem:[%s1334_s1 + $0x8] sm:$0xff] (!%p264_p2)  ;;  %v313_v2 = vld [vmem:[%s1334_s1 + $0x10] sm:$0xff] (!%p264_p2)  ;;  %s839_s13 = sshll.u32 (!%p264_p2), %s834_s28, 1  ;;  %vm322_vm0 = vcmask (!%p264_p2), 261120   ;;  %v1028_v56 = vmov (!%p264_p2), 0.0  }
   0x6   : > { %267 = sbr.rel (%p264_p2) target bundleno = 1072 (0x430), region = 52  ;;  %v923_v3 = vpack.c.bf16 (!%p264_p2), %v312_v1, %v311_v0  ;;  %v314_v4 = vld [vmem:[%s1334_s1 + $0x18] sm:$0xff] (!%p264_p2)  ;;  %p298_p3 = scmp.lt.s32.totalorder (!%p264_p2), %s839_s13, 5  ;;  %v407_v5 = vld [vmem:[%s1336_s3 + $0x8] sm:$0xff] (!%p264_p2)  ;;  %v406_v9 = vld [vmem:[%s1336_s3] sm:$0xff] (!%p264_p2)  ;;  %514 = vmatprep.mubr.f32.mxu1 (!%p264_p2), %v1028_v56  ;;  %vm645_vm1 = vcmask (!%p264_p2), 64512  }
   0x7   : > { %v409_v6 = vld [vmem:[%s1336_s3 + $0x18] sm:$0xff] (!%p264_p2)  ;;  %v927_v7 = vpack.c.bf16 (!%p264_p2), %v314_v4, %v313_v2  ;;  %v408_v10 = vld [vmem:[%s1336_s3 + $0x10] sm:$0xff] (!%p264_p2)  ;;  %v411_v11 = vld [vmem:[%s1336_s3 + $0x28] sm:$0xff] (!%p264_p2)  ;;  %vm652_vm2 = vcmask (!%p264_p2), 130112   ;;  %vm659_vm3 = vcmask (!%p264_p2), 195712   ;;  %vm666_vm4 = vcmask (!%p264_p2), 261312  }
   0x8   : > { %v931_v8 = vpack.c.bf16 (!%p264_p2), %v409_v6, %v407_v5  ;;  %924 = vmatprep.subr.bf16.mxu0 (!%p264_p2), %v923_v3  ;;  %v933_v12 = vpack.c.bf16 (!%p264_p2), %v408_v10, %v406_v9  ;;  %v413_v13 = vld [vmem:[%s1336_s3 + $0x38] sm:$0xff] (!%p264_p2)  ;;  %v410_v14 = vld [vmem:[%s1336_s3 + $0x20] sm:$0xff] (!%p264_p2)  ;;  %v412_v15 = vld [vmem:[%s1336_s3 + $0x30] sm:$0xff] (!%p264_p2)  ;;  %vm675_vm5 = vcmask (!%p264_p2), 130048   ;;  %vm678_vm6 = vcmask (!%p264_p2), 195584  }
   0x9   : > { %926 = vmatpush3.bf16.msra.mxu0 (!%p264_p2), %v923_v3  ;;  %v935_v16 = vpack.c.bf16 (!%p264_p2), %v413_v13, %v411_v11  ;;  %v415_v17 = vld [vmem:[%s1336_s3 + $0x48] sm:$0xff] (!%p264_p2)  ;;  %v417_v18 = vld [vmem:[%s1336_s3 + $0x58] sm:$0xff] (!%p264_p2)  ;;  %v937_v19 = vpack.c.bf16 (!%p264_p2), %v412_v15, %v410_v14  ;;  %v414_v21 = vld [vmem:[%s1336_s3 + $0x40] sm:$0xff] (!%p264_p2) }
   0xa   : > { %932 = vmatprep.subr.bf16.mxu1 (!%p264_p2), %v931_v8  ;;  %928 = vmatprep.subr.bf16.mxu0 (!%p264_p2), %v927_v7  ;;  %v939_v20 = vpack.c.bf16 (!%p264_p2), %v417_v18, %v415_v17  ;;  %v416_v22 = vld [vmem:[%s1336_s3 + $0x50] sm:$0xff] (!%p264_p2)  ;;  %v419_v24 = vld [vmem:[%s1336_s3 + $0x68] sm:$0xff] (!%p264_p2)  ;;  %v421_v25 = vld [vmem:[%s1336_s3 + $0x78] sm:$0xff] (!%p264_p2) }
   0xb   : > { %934 = vmatpush1.bf16.msra.mxu1 (!%p264_p2), %v933_v12  ;;  %v941_v27 = vpack.c.bf16 (!%p264_p2), %v416_v22, %v414_v21  ;;  %v943_v28 = vpack.c.bf16 (!%p264_p2), %v421_v25, %v419_v24  ;;  %v418_v29 = vld [vmem:[%s1336_s3 + $0x60] sm:$0xff] (!%p264_p2)  ;;  %v420_v30 = vld [vmem:[%s1336_s3 + $0x70] sm:$0xff] (!%p264_p2)  ;;  %v423_v31 = vld [vmem:[%s1336_s3 + $0x88] sm:$0xff] (!%p264_p2) }
   0xc   : > { %936 = vmatprep.subr.bf16.mxu1 (!%p264_p2), %v935_v16  ;;  %v425_v32 = vld [vmem:[%s1336_s3 + $0x98] sm:$0xff] (!%p264_p2)  ;;  %v945_v33 = vpack.c.bf16 (!%p264_p2), %v420_v30, %v418_v29  ;;  %v422_v35 = vld [vmem:[%s1336_s3 + $0x80] sm:$0xff] (!%p264_p2)  ;;  %v424_v36 = vld [vmem:[%s1336_s3 + $0x90] sm:$0xff] (!%p264_p2) }
   0xd   : > { %s1343_s13 = smov (!%p298_p3, %s839_s13), 5  ;;  %930 = vmatpush3.bf16.msra.mxu0 %v927_v7  ;;  %v947_v34 = vpack.c.bf16 %v425_v32, %v423_v31  ;;  %v427_v37 = vld [vmem:[%s1336_s3 + $0xa8] sm:$0xff]  ;;  %v429_v38 = vld [vmem:[%s1336_s3 + $0xb8] sm:$0xff]  ;;  %v949_v39 = vpack.c.bf16 %v424_v36, %v422_v35  ;;  %v426_v41 = vld [vmem:[%s1336_s3 + $0xa0] sm:$0xff] }
   0xe   : > { %s840_s16 = sshll.u32 %s1343_s13, 3  ;;  %v951_v40 = vpack.c.bf16 %v429_v38, %v427_v37  ;;  %v428_v42 = vld [vmem:[%s1336_s3 + $0xb0] sm:$0xff]  ;;  %v431_v43 = vld [vmem:[%s1336_s3 + $0xc8] sm:$0xff]  ;;  %v433_v44 = vld [vmem:[%s1336_s3 + $0xd8] sm:$0xff] }
   0xf   : > { %s301_s19 = scalar_lea.vmem %s1333_s0, %s840_s16  ;;  %938 = vmatpush1.bf16.msra.mxu1 %v937_v19  ;;  %v953_v45 = vpack.c.bf16 %v428_v42, %v426_v41  ;;  %v955_v46 = vpack.c.bf16 %v433_v44, %v431_v43  ;;  %v430_v47 = vld [vmem:[%s1336_s3 + $0xc0] sm:$0xff]  ;;  %v432_v48 = vld [vmem:[%s1336_s3 + $0xd0] sm:$0xff]  ;;  %v435_v50 = vld [vmem:[%s1336_s3 + $0xe8] sm:$0xff]  ;;  %s307_s9 = scalar_lea.vmem %s1341_s8, %s840_s16 }
  0x10   : > { %v309_v23 = vld [vmem:[%s301_s19] sm:$0xff]  ;;  %v310_v26 = vld [vmem:[%s301_s19 + $0x8] sm:$0xff]  ;;  %940 = vmatprep.subr.bf16.mxu1 %v939_v20  ;;  %v957_v49 = vpack.c.bf16 %v432_v48, %v430_v47  ;;  %v437_v51 = vld [vmem:[%s1336_s3 + $0xf8] sm:$0xff]  ;;  %v440_v48 = vlaneseq }
  0x11   : > { %909 = vmatprep.mubr.msk.f32.mxu0 %vm322_vm0, %v309_v23  ;;  %v959_v52 = vpack.c.bf16 %v437_v51, %v435_v50  ;;  %v434_v53 = vld [vmem:[%s1336_s3 + $0xe0] sm:$0xff]  ;;  %v436_v54 = vld [vmem:[%s1336_s3 + $0xf0] sm:$0xff]  ;;  %v548_v58 = vld [vmem:[%s1338_s5 + $0x88] sm:$0xff] }
  0x12   : > { %910 = vmatmul.mubr.msk.f32.vlgmr.msra.gmra.mrb[0].mxu0 %vm322_vm0, %v310_v26  ;;  %v961_v55 = vpack.c.bf16 %v436_v54, %v434_v53  ;;  %v547_v57 = vld [vmem:[%s1338_s5 + $0x80] sm:$0xff]  ;;  %v532_v61 = vld [vmem:[%s1338_s5 + $0x8] sm:$0xff]  ;;  %v549_v62 = vld [vmem:[%s1338_s5 + $0x90] sm:$0xff] }
  0x13   : > { %942 = vmatpush1.bf16.msra.mxu1 %v941_v27  ;;  %v531_v59 = vld [vmem:[%s1338_s5] sm:$0xff]  ;;  %v963_v60 = vpack.c.bf16 %v548_v58, %v547_v57  ;;  %v550_v63 = vld [vmem:[%s1338_s5 + $0x98] sm:$0xff]  ;;  %v533_v2 = vld [vmem:[%s1338_s5 + $0x10] sm:$0xff] }
  0x14   : > { %944 = vmatprep.subr.bf16.mxu1 %v943_v28  ;;  %v965_v0 = vpack.c.bf16 %v532_v61, %v531_v59  ;;  %v967_v1 = vpack.c.bf16 %v550_v63, %v549_v62  ;;  %v534_v3 = vld [vmem:[%s1338_s5 + $0x18] sm:$0xff]  ;;  %v551_v4 = vld [vmem:[%s1338_s5 + $0xa0] sm:$0xff]  ;;  %v552_v5 = vld [vmem:[%s1338_s5 + $0xa8] sm:$0xff] }
  0x15   : > { %964 = vmatprep.subr.bf16.mxu0 %v963_v60  ;;  %v969_v6 = vpack.c.bf16 %v534_v3, %v533_v2  ;;  %v971_v7 = vpack.c.bf16 %v552_v5, %v551_v4  ;;  %v535_v8 = vld [vmem:[%s1338_s5 + $0x20] sm:$0xff]  ;;  %v536_v9 = vld [vmem:[%s1338_s5 + $0x28] sm:$0xff]  ;;  %v553_v10 = vld [vmem:[%s1338_s5 + $0xb0] sm:$0xff] }
  0x16   : > { %966 = vmatpush3.bf16.msra.mxu0 %v965_v0  ;;  %v554_v11 = vld [vmem:[%s1338_s5 + $0xb8] sm:$0xff]  ;;  %v973_v12 = vpack.c.bf16 %v536_v9, %v535_v8  ;;  %v537_v14 = vld [vmem:[%s1338_s5 + $0x30] sm:$0xff]  ;;  %v555_v16 = vld [vmem:[%s1338_s5 + $0xc0] sm:$0xff] }
  0x17   : > { %946 = vmatpush1.bf16.msra.mxu1 %v945_v33  ;;  %968 = vmatprep.subr.bf16.mxu0 %v967_v1  ;;  %v975_v13 = vpack.c.bf16 %v554_v11, %v553_v10  ;;  %v538_v15 = vld [vmem:[%s1338_s5 + $0x38] sm:$0xff]  ;;  %v556_v17 = vld [vmem:[%s1338_s5 + $0xc8] sm:$0xff]  ;;  %v539_v20 = vld [vmem:[%s1338_s5 + $0x40] sm:$0xff] }
  0x18   : > { %948 = vmatprep.subr.bf16.mxu1 %v947_v34  ;;  %v977_v18 = vpack.c.bf16 %v538_v15, %v537_v14  ;;  %v979_v19 = vpack.c.bf16 %v556_v17, %v555_v16  ;;  %v540_v21 = vld [vmem:[%s1338_s5 + $0x48] sm:$0xff]  ;;  %v557_v22 = vld [vmem:[%s1338_s5 + $0xd0] sm:$0xff]  ;;  %v558_v23 = vld [vmem:[%s1338_s5 + $0xd8] sm:$0xff] }
  0x19   : > { %v981_v24 = vpack.c.bf16 %v540_v21, %v539_v20  ;;  %v983_v25 = vpack.c.bf16 %v558_v23, %v557_v22  ;;  %v541_v26 = vld [vmem:[%s1338_s5 + $0x50] sm:$0xff]  ;;  %v542_v27 = vld [vmem:[%s1338_s5 + $0x58] sm:$0xff]  ;;  %v559_v28 = vld [vmem:[%s1338_s5 + $0xe0] sm:$0xff] }
  0x1a   : > { %970 = vmatpush3.bf16.msra.mxu0 %v969_v6  ;;  %v560_v29 = vld [vmem:[%s1338_s5 + $0xe8] sm:$0xff]  ;;  %v985_v30 = vpack.c.bf16 %v542_v27, %v541_v26  ;;  %v843_v32 = vld [vmem:[%s1335_s2] ss:$0 sm:$0xff]  ;;  %v561_v42 = vld [vmem:[%s1338_s5 + $0xf0] sm:$0xff] }
  0x1b   : > { %950 = vmatpush1.bf16.msra.mxu1 %v949_v39  ;;  %972 = vmatprep.subr.bf16.mxu0 %v971_v7  ;;  %v987_v31 = vpack.c.bf16 %v560_v29, %v559_v28  ;;  %v543_v39 = vld [vmem:[%s1338_s5 + $0x60] sm:$0xff]  ;;  %v562_v43 = vld [vmem:[%s1338_s5 + $0xf8] sm:$0xff]  ;;  %v688_v21 = vld [vmem:[%s1340_s7 + $0x8] sm:$0xff] }
  0x1c   : > { %952 = vmatprep.subr.bf16.mxu1 %v951_v40  ;;  %v544_v40 = vld [vmem:[%s1338_s5 + $0x68] sm:$0xff]  ;;  %v991_v44 = vpack.c.bf16 %v562_v43, %v561_v42  ;;  %v438_v51 = vld [vmem:[%s1337_s4] sm:$0x3]  ;;  %v689_v22 = vld [vmem:[%s1340_s7 + $0x10] sm:$0xff] }
  0x1d   : > { %v989_v41 = vpack.c.bf16 %v544_v40, %v543_v39  ;;  %v846_v4 = vld [vmem:[%s1339_s6] ss:$0 sm:$0xff] }
  0x1e   : > { %974 = vmatpush3.bf16.msra.mxu0 %v973_v12  ;;  %v687_v20 = vld [vmem:[%s1340_s7] sm:$0xff] }
  0x1f   : > { %954 = vmatpush1.bf16.msra.mxu1 %v953_v45  ;;  %976 = vmatprep.subr.bf16.mxu0 %v975_v13  ;;  %v545_v45 = vld [vmem:[%s1338_s5 + $0x70] sm:$0xff]  ;;  %v995_v23 = vpack.c.bf16 %v688_v21, %v687_v20 }
  0x20   : > { %956 = vmatprep.subr.bf16.mxu1 %v955_v46  ;;  %v546_v46 = vld [vmem:[%s1338_s5 + $0x78] sm:$0xff] }
  0x21   : > { %v993_v47 = vpack.c.bf16 %v546_v46, %v545_v45 }
  0x22   : > { %978 = vmatpush3.bf16.msra.mxu0 %v977_v18 }
  0x23   : > { %958 = vmatpush1.bf16.msra.mxu1 %v957_v49  ;;  %980 = vmatprep.subr.bf16.mxu0 %v979_v19  ;;  %v441_v49 = vshrl.u32 %v440_v48, 7 }
  0x24   : > { %960 = vmatprep.subr.bf16.mxu1 %v959_v52 }
  0x25   : > { %v442_v50 = vsub.s32 0, %v441_v49  ;;  %v446_v52 = vsub.s32 1, %v441_v49 }
  0x26   : > { %982 = vmatpush3.bf16.msra.mxu0 %v981_v24  ;;  %v690_v24 = vld [vmem:[%s1340_s7 + $0x18] sm:$0xff] }
  0x27   : > { %962 = vmatpush1.bf16.msra.mxu1 %v961_v55  ;;  %984 = vmatprep.subr.bf16.mxu0 %v983_v25  ;;  %v443_v53 = vrot.slane %v438_v51, %v442_v50  ;;  %v447_v54 = vrot.slane %v438_v51, %v446_v52  ;;  %v999_v25 = vpack.c.bf16 %v690_v24, %v689_v22 }
  0x28   : > { %996 = vmatprep.subr.bf16.mxu1 %v995_v23 }
  0x2a   : > { %986 = vmatpush3.bf16.msra.mxu0 %v985_v30 }
  0x2b   : > { %988 = vmatprep.subr.bf16.mxu0 %v987_v31 }
  0x2e   : > { %990 = vmatpush3.bf16.msra.mxu0 %v989_v41 }
  0x2f   : > { %992 = vmatprep.subr.bf16.mxu0 %v991_v44 }
  0x32   : > { %994 = vmatpush3.bf16.msra.mxu0 %v993_v47 }
  0xe5   : > { %v911_v33 = vpop.f32.mrb[0].mxu0 }
  0xe6   : > { %v395_v34 = vpop.f32.mrb[1].mxu0  ;;  %v401_v36 = vadd.f32 %v911_v33, %v843_v32 }
  0xe7   : > { %v396_v35 = vadd.f32 %v843_v32, %v395_v34 }
  0xe8   : > { %v405_v38 = vmax.f32 %v401_v36, 0.0 }
  0xe9   : > { %v404_v37 = vmax.f32 %v396_v35, 0.0 }
  0xeb   : > { %515 = vmatmul.mubr.f32.vlgmr.msra.gmra.mrb[0].mxu1 %v404_v37 }
  0xec   : > { %520 = vmatprep.mubr.f32.mxu1 %v1028_v56  ;;  %998 = vmatpush3.bf16.msra.mxu1 %v995_v23 }
  0xed   : > { %1000 = vmatprep.subr.bf16.mxu1 %v999_v25 }
  0xef   : > { %521 = vmatmul.mubr.f32.gmra.mrb[2].mxu1 %v405_v38 }
  0xf0   : > { %1002 = vmatpush3.bf16.msra.mxu1 %v999_v25 }
 0x1be   : > { %v516_v55 = vpop.f32.mrb[0].mxu1 }
 0x1bf   : > { %v517_v56 = vadd.f32 %v516_v55, %v443_v53  ;;  %v518_v57 = vpop.f32.mrb[1].mxu1 }
 0x1c0   : > { %v519_v58 = vadd.f32 %v518_v57, %v447_v54 }
 0x1c1   : > { %v527_v61 = vmax.f32 %v517_v56, 0.0 }
 0x1c2   : > { %v528_v59 = vmax.f32 %v519_v58, 0.0  ;;  %v522_v60 = vpop.f32.mrb[2].mxu1 }
 0x1c3   : > { %v523_v62 = vadd.f32 %v522_v60, %v443_v53  ;;  %v524_v63 = vpop.f32.mrb[3].mxu1 }
 0x1c4   : > { %v525_v0 = vadd.f32 %v524_v63, %v447_v54  ;;  %634 = vmatprep.mubr.f32.mxu0 %v528_v59 }
 0x1c5   : > { %635 = vmatmul.mubr.f32.vlgmr.msra.gmra.mrb[2].mxu0 %v527_v61  ;;  %v529_v2 = vmax.f32 %v523_v62, 0.0 }
 0x1c6   : > { %v530_v1 = vmax.f32 %v525_v0, 0.0 }
 0x1c8   : > { %639 = vmatprep.mubr.f32.mxu0 %v530_v1 }
 0x1c9   : > { %640 = vmatmul.mubr.f32.gmra.mrb[4].mxu0 %v529_v2 }
 0x298   : > { %v889_v3 = vpop.f32.mrb[2].mxu0 }
 0x299   : > { %v890_v5 = vpop.f32.mrb[3].mxu0 }
 0x29a   : > { %v891_v6 = vadd.f32 %v890_v5, %v889_v3 }
 0x29c   : > { %v637_v7 = vadd.f32 %v891_v6, %v846_v4  ;;  %v892_v8 = vpop.f32.mrb[4].mxu0 }
 0x29d   : > { %v893_v9 = vpop.f32.mrb[5].mxu0 }
 0x29e   : > { %v894_v10 = vadd.f32 %v893_v9, %v892_v8  ;;  %v646_v11 = vsel %vm645_vm1, %v637_v7, -inf  ;;  %v653_v14 = vsel %vm652_vm2, %v637_v7, -inf  ;;  %v660_v16 = vsel %vm659_vm3, %v637_v7, -inf }
 0x29f   : > { %647 = vmax.xlane.f32.xlu0 %v646_v11  ;;  %v667_v18 = vsel %vm666_vm4, %v637_v7, -inf }
 0x2a0   : > { %v642_v12 = vadd.f32 %v894_v10, %v846_v4 }
 0x2a2   : > { %v649_v13 = vsel %vm645_vm1, %v642_v12, -inf  ;;  %v656_v15 = vsel %vm652_vm2, %v642_v12, -inf  ;;  %v663_v17 = vsel %vm659_vm3, %v642_v12, -inf  ;;  %v670_v19 = vsel %vm666_vm4, %v642_v12, -inf }
 0x2a3   : > { %650 = vmax.xlane.f32.xlu1 %v649_v13  ;;  %654 = vmax.xlane.f32.xlu0 %v653_v14 }
 0x2a7   : > { %657 = vmax.xlane.f32.xlu1 %v656_v15  ;;  %661 = vmax.xlane.f32.xlu0 %v660_v16 }
 0x2ab   : > { %664 = vmax.xlane.f32.xlu1 %v663_v17  ;;  %668 = vmax.xlane.f32.xlu0 %v667_v18 }
 0x2af   : > { %671 = vmax.xlane.f32.xlu1 %v670_v19 }
 0x32c   : > { %v648_v26 = vpop.xlane.xlu0 %647 }
 0x330   : > { %v651_v27 = vpop.xlane.xlu1 %650  ;;  %v655_v28 = vpop.xlane.xlu0 %654 }
 0x331   : > { %v673_v31 = vsel %vm645_vm1, %v648_v26, %v655_v28 }
 0x334   : > { %v658_v29 = vpop.xlane.xlu1 %657  ;;  %v662_v30 = vpop.xlane.xlu0 %661 }
 0x335   : > { %v676_v32 = vsel %vm675_vm5, %v673_v31, %v662_v30  ;;  %v674_v37 = vsel %vm645_vm1, %v651_v27, %v658_v29 }
 0x338   : > { %v665_v33 = vpop.xlane.xlu1 %664  ;;  %v669_v34 = vpop.xlane.xlu0 %668 }
 0x339   : > { %v679_v35 = vsel %vm678_vm6, %v676_v32, %v669_v34  ;;  %v677_v38 = vsel %vm675_vm5, %v674_v37, %v665_v33 }
 0x33a   : > { %v681_v36 = vsub.f32 %v637_v7, %v679_v35 }
 0x33c   : > { %v683_v39 = vmul.f32 1.442695, %v681_v36  ;;  %v672_v40 = vpop.xlane.xlu1 %671 }
 0x33d   : > { %v680_v41 = vsel %vm678_vm6, %v677_v38, %v672_v40 }
 0x33e   : > { %1012 = vpow2.f32 %v683_v39  ;;  %v682_v42 = vsub.f32 %v642_v12, %v680_v41 }
 0x340   : > { %v685_v43 = vmul.f32 1.442695, %v682_v42 }
 0x342   : > { %1014 = vpow2.f32 %v685_v43 }
 0x348   : > { %v1013_v44 = vpop.eup %1012 }
 0x349   : > { %920 = vmatprep.mubr.msk.f32.mxu1 %vm322_vm0, %v1013_v44 }
 0x34c   : > { %v1015_v45 = vpop.eup %1014 }
 0x34d   : > { %921 = vmatmul.mubr.msk.f32.vlgmr.msra.gmra.mrb[4].mxu1 %vm322_vm0, %v1015_v45 }
 0x420   : > { %v922_v46 = vpop.f32.mrb[4].mxu1 }
 0x421   : > { %1016 = vrcp.f32 %v922_v46  ;;  %v763_v47 = vpop.f32.mrb[5].mxu1 }
 0x422   : > { %1018 = vrcp.f32 %v763_v47 }
 0x42b   : > { %v1017_v48 = vpop.eup %1016 }
 0x42c   : > { %v1019_v49 = vpop.eup %1018  ;;  %v775_v51 = vmul.f32 %v1017_v48, %v1015_v45 }
 0x42d   : > { %v774_v50 = vmul.f32 %v1019_v49, %v1013_v44 }
 0x42e   : > { %777 = vst.msk [vmem:[%s307_s9 + $0x8] sm:$0xff] %vm322_vm0, %v775_v51 }
 0x42f   : > { %776 = vst.msk [vmem:[%s307_s9] sm:$0xff] %vm322_vm0, %v774_v50 }
 0x430 PF: > { %s18_s27 = sadd.s32 1, %s1026_s27  }
 0x431   : > { %p15_p4 = scmp.ge.s32.totalorder %s18_s27, 5  }
 0x433   :  { %17 = sbr.rel (!%p15_p4) target bundleno = 1 (0x1), region = 82 }

</bundles_post_ra>
